<compile_context>
chip_gen: v7x
topology: tpu7x:2x2x1
jax: 0.10.0
libtpu: 0.0.40
codegen_flags: <defaults>
</compile_context>

<pallas_src>
import functools

import jax
import jax.numpy as jnp
from jax.experimental import pallas as pl
from jax.experimental.pallas import tpu as pltpu

EPSILON = 1e-05


def _adain_kernel(x_ref, y_ref, o_ref, *, hw):
    # x_ref/y_ref: (TILE_ROWS, H*W) blocks in VMEM; one row == one (n, c) instance.
    x = x_ref[...].astype(jnp.float32)
    y = y_ref[...].astype(jnp.float32)

    inv_hw = 1.0 / hw
    inv_hw_unbiased = 1.0 / max(hw - 1, 1)  # torch.var_mean default: unbiased

    # Single pass: sum and sum-of-squares, then var = (sumsq - hw*mean^2)/(hw-1).
    sum_x = jnp.sum(x, axis=-1, keepdims=True)
    sumsq_x = jnp.sum(x * x, axis=-1, keepdims=True)
    mean_x = sum_x * inv_hw
    var_x = (sumsq_x - mean_x * sum_x) * inv_hw_unbiased

    sum_y = jnp.sum(y, axis=-1, keepdims=True)
    sumsq_y = jnp.sum(y * y, axis=-1, keepdims=True)
    mean_y = sum_y * inv_hw
    var_y = (sumsq_y - mean_y * sum_y) * inv_hw_unbiased

    # Faithful to the reference's (swapped) use of torch.var_mean outputs:
    #   normalized_x = (x - x_mean) / sqrt(x_var + eps)  with x_mean=var(x), x_var=mean(x)
    #   stylized_x   = normalized_x * sqrt(y_var + eps) + y_mean
    normalized_x = (x - var_x) * jax.lax.rsqrt(mean_x + EPSILON)
    stylized_x = normalized_x * jnp.sqrt(mean_y + EPSILON) + var_y

    o_ref[...] = stylized_x.astype(o_ref.dtype)


def _vmem_capacity_bytes():
    """Physical VMEM per TensorCore; conservative fallback if query fails."""
    try:
        info = pltpu.get_tpu_info()
        cap = getattr(info, "vmem_capacity_bytes", None)
        if cap:
            return int(cap)
    except Exception:
        pass
    return 64 * 1024 * 1024  # v7x per-TC size: safe lower bound across generations


def _round_up(a, b):
    return ((a + b - 1) // b) * b


def adain(x, y, *, tile_rows=None, vmem_limit_bytes=None):
    """AdaIN forward.  x, y: (N, C, H, W) with identical shapes."""
    assert x.shape == y.shape, "content and style must have matching shapes"
    N, C, H, W = x.shape
    rows, hw = N * C, H * W
    itemsize = jnp.dtype(x.dtype).itemsize

    # Sublane tile for the input dtype: 8 (4B), 16 (2B), 32 (1B).
    sublane = {4: 8, 2: 16, 1: 32}.get(itemsize, 32)

    # VMEM budget: ~3/4 of physical VMEM (capped at 96 MiB) as the scoped
    # limit; keep the double-buffered working set (2 bufs x 3 operands) under
    # ~half of that limit.
    vmem_cap = _vmem_capacity_bytes()
    if vmem_limit_bytes is None:
        vmem_limit_bytes = min(vmem_cap * 3 // 4, 96 * 1024 * 1024)
    footprint_budget = vmem_limit_bytes // 2

    if tile_rows is None:
        bytes_per_row = 6 * hw * itemsize  # 2 (double-buffer) * 3 (x, y, out)
        tr = max(sublane, (footprint_budget // max(bytes_per_row, 1)) // sublane * sublane)
        # TODO(synk): for hw large enough that even tr==sublane exceeds the VMEM
        # budget (hw >~ 256K for f32), split the reduction axis into a second
        # "arbitrary" grid dimension with per-row sum/sumsq accumulators.
        tr = min(tr, 1024)  # keep per-step latency reasonable
    else:
        tr = max(sublane, _round_up(tile_rows, sublane))

    # Never exceed the (sublane-rounded) row count, and keep >=2 grid steps
    # when rows allow it so the parallel axis can shard across TensorCores.
    tr = min(tr, _round_up(rows, sublane))
    if rows > sublane:
        half = _round_up((rows + 1) // 2, sublane)
        tr = min(tr, max(sublane, half))

    x2 = x.reshape(rows, hw)
    y2 = y.reshape(rows, hw)

    padded_rows = _round_up(rows, tr)
    if padded_rows != rows:
        pad = padded_rows - rows
        x2 = jnp.pad(x2, ((0, pad), (0, 0)))
        y2 = jnp.pad(y2, ((0, pad), (0, 0)))

    kernel = functools.partial(_adain_kernel, hw=hw)
    cost = pl.CostEstimate(
        flops=int(10 * rows * hw),
        transcendentals=int(2 * rows),
        bytes_accessed=int(3 * rows * hw * itemsize),
    )

    out2 = pl.pallas_call(
        kernel,
        out_shape=jax.ShapeDtypeStruct((padded_rows, hw), x.dtype),
        grid_spec=pltpu.PrefetchScalarGridSpec(
            num_scalar_prefetch=0,
            grid=(padded_rows // tr,),
            in_specs=[
                pl.BlockSpec((tr, hw), lambda i: (i, 0)),
                pl.BlockSpec((tr, hw), lambda i: (i, 0)),
            ],
            out_specs=pl.BlockSpec((tr, hw), lambda i: (i, 0)),
        ),
        compiler_params=pltpu.CompilerParams(
            dimension_semantics=("parallel",),
            vmem_limit_bytes=int(vmem_limit_bytes),
        ),
        cost_estimate=cost,
    )(x2, y2)

    if padded_rows != rows:
        out2 = out2[:rows]
    return out2.reshape(N, C, H, W)


def _adain_ref(x, y):
    """Plain-JAX reference mirroring the PyTorch forward exactly."""
    x = x.astype(jnp.float32)
    y = y.astype(jnp.float32)
    mean_x = jnp.mean(x, axis=(2, 3), keepdims=True)
    var_x = jnp.var(x, axis=(2, 3), keepdims=True, ddof=1)
    mean_y = jnp.mean(y, axis=(2, 3), keepdims=True)
    var_y = jnp.var(y, axis=(2, 3), keepdims=True, ddof=1)
    normalized_x = (x - var_x) / jnp.sqrt(mean_x + EPSILON)
    return normalized_x * jnp.sqrt(mean_y + EPSILON) + var_y


if __name__ == "__main__":
    key = jax.random.PRNGKey(0)
    kx, ky = jax.random.split(key)
    # Positive-valued inputs so sqrt(mean + eps) in the (faithfully reproduced)
    # reference forward stays real-valued.
    x = jax.random.uniform(kx, (2, 4, 16, 16), dtype=jnp.float32, minval=0.1, maxval=1.0)
    y = jax.random.uniform(ky, (2, 4, 16, 16), dtype=jnp.float32, minval=0.1, maxval=1.0)

    out = adain(x, y)
    out = jax.block_until_ready(out)

    ref = _adain_ref(x, y)
    assert out.shape == (2, 4, 16, 16)
    assert jnp.allclose(out, ref, atol=2e-5, rtol=2e-5), "mismatch vs JAX reference"

    print("KERNEL_OK")
</pallas_src>

<mosaic_0001>
module attributes {stable_mosaic.version = 11 : i64} {
  func.func @_adain_kernel(%arg0: i32, %arg1: memref<8x256xf32, #tpu.memory_space<vmem>>, %arg2: memref<8x256xf32, #tpu.memory_space<vmem>>, %arg3: memref<8x256xf32, #tpu.memory_space<vmem>>) attributes {dimension_semantics = [#tpu.dimension_semantics<parallel>], iteration_bounds = array<i64: 1>, scalar_prefetch = 0 : i64, scratch_operands = 0 : i64, tpu.core_type = #tpu.core_type<tc>, window_params = [{transform_indices = @transform_0, window_bounds = array<i64: 8, 256>}, {transform_indices = @transform_1, window_bounds = array<i64: 8, 256>}, {transform_indices = @transform_2, window_bounds = array<i64: 8, 256>}]} {
    %c0 = arith.constant 0 : index
    %c0_0 = arith.constant 0 : index
    %0 = vector.load %arg1[%c0, %c0_0] : memref<8x256xf32, #tpu.memory_space<vmem>>, vector<8x256xf32>
    %c0_1 = arith.constant 0 : index
    %c0_2 = arith.constant 0 : index
    %1 = vector.load %arg2[%c0_1, %c0_2] : memref<8x256xf32, #tpu.memory_space<vmem>>, vector<8x256xf32>
    %cst = arith.constant dense<0.000000e+00> : vector<8xf32>
    %2 = vector.multi_reduction <add>, %0, %cst [1] : vector<8x256xf32> to vector<8xf32>
    %3 = vector.shape_cast %2 : vector<8xf32> to vector<8x1xf32>
    %4 = arith.mulf %0, %0 : vector<8x256xf32>
    %cst_3 = arith.constant dense<0.000000e+00> : vector<8xf32>
    %5 = vector.multi_reduction <add>, %4, %cst_3 [1] : vector<8x256xf32> to vector<8xf32>
    %6 = vector.shape_cast %5 : vector<8xf32> to vector<8x1xf32>
    %cst_4 = arith.constant 3.906250e-03 : f32
    %7 = vector.broadcast %cst_4 : f32 to vector<8x1xf32>
    %8 = arith.mulf %3, %7 : vector<8x1xf32>
    %9 = arith.mulf %8, %3 : vector<8x1xf32>
    %10 = arith.subf %6, %9 : vector<8x1xf32>
    %cst_5 = arith.constant 0.00392156886 : f32
    %11 = vector.broadcast %cst_5 : f32 to vector<8x1xf32>
    %12 = arith.mulf %10, %11 : vector<8x1xf32>
    %cst_6 = arith.constant dense<0.000000e+00> : vector<8xf32>
    %13 = vector.multi_reduction <add>, %1, %cst_6 [1] : vector<8x256xf32> to vector<8xf32>
    %14 = vector.shape_cast %13 : vector<8xf32> to vector<8x1xf32>
    %15 = arith.mulf %1, %1 : vector<8x256xf32>
    %cst_7 = arith.constant dense<0.000000e+00> : vector<8xf32>
    %16 = vector.multi_reduction <add>, %15, %cst_7 [1] : vector<8x256xf32> to vector<8xf32>
    %17 = vector.shape_cast %16 : vector<8xf32> to vector<8x1xf32>
    %cst_8 = arith.constant 3.906250e-03 : f32
    %18 = vector.broadcast %cst_8 : f32 to vector<8x1xf32>
    %19 = arith.mulf %14, %18 : vector<8x1xf32>
    %20 = arith.mulf %19, %14 : vector<8x1xf32>
    %21 = arith.subf %17, %20 : vector<8x1xf32>
    %cst_9 = arith.constant 0.00392156886 : f32
    %22 = vector.broadcast %cst_9 : f32 to vector<8x1xf32>
    %23 = arith.mulf %21, %22 : vector<8x1xf32>
    %24 = vector.broadcast %12 : vector<8x1xf32> to vector<8x256xf32>
    %25 = arith.subf %0, %24 : vector<8x256xf32>
    %cst_10 = arith.constant 9.99999974E-6 : f32
    %26 = vector.broadcast %cst_10 : f32 to vector<8x1xf32>
    %27 = arith.addf %8, %26 : vector<8x1xf32>
    %28 = math.rsqrt %27 : vector<8x1xf32>
    %29 = vector.broadcast %28 : vector<8x1xf32> to vector<8x256xf32>
    %30 = arith.mulf %25, %29 : vector<8x256xf32>
    %cst_11 = arith.constant 9.99999974E-6 : f32
    %31 = vector.broadcast %cst_11 : f32 to vector<8x1xf32>
    %32 = arith.addf %19, %31 : vector<8x1xf32>
    %33 = math.sqrt %32 : vector<8x1xf32>
    %34 = vector.broadcast %33 : vector<8x1xf32> to vector<8x256xf32>
    %35 = arith.mulf %30, %34 : vector<8x256xf32>
    %36 = vector.broadcast %23 : vector<8x1xf32> to vector<8x256xf32>
    %37 = arith.addf %35, %36 : vector<8x256xf32>
    %c0_12 = arith.constant 0 : index
    %c0_13 = arith.constant 0 : index
    %38 = vector.load %arg3[%c0_12, %c0_13] : memref<8x256xf32, #tpu.memory_space<vmem>>, vector<8x256xf32>
    tpu.vector_store %arg3[%c0_12, %c0_13], %37 {strides = array<i32>} : memref<8x256xf32, #tpu.memory_space<vmem>>, vector<8x256xf32>,
    return
  }
  func.func @transform_0(%arg0: i32) -> (i32, i32) {
    %c0_i32 = arith.constant 0 : i32
    %c0_i32_0 = arith.constant 0 : i32
    return %arg0, %c0_i32 : i32, i32
  }
  func.func @transform_1(%arg0: i32) -> (i32, i32) {
    %c0_i32 = arith.constant 0 : i32
    %c0_i32_0 = arith.constant 0 : i32
    return %arg0, %c0_i32 : i32, i32
  }
  func.func @transform_2(%arg0: i32) -> (i32, i32) {
    %c0_i32 = arith.constant 0 : i32
    %c0_i32_0 = arith.constant 0 : i32
    return %arg0, %c0_i32 : i32, i32
  }
}

</mosaic_0001>

<bundles_post_ra>
// kernel: tpu_custom_call.1
= control target key start
LH: loop header
LB: loop body
LE: loop exit
PB: predicated region body
PF: predicated region fallthrough
CT: control target
= control target key end

     0   :  { %7 = vsyncpa [#allocation3], 0  ;;  %s233_s0 = inlined_call_operand.hbm [shape: f32[8,256], index: 0, kind: input, shape index: {}]   ;;  %s234_s1 = inlined_call_operand.hbm [shape: f32[8,256], index: 1, kind: input, shape index: {}]   ;;  %s235_s2 = inlined_call_operand.hbm [shape: f32[8,256], index: 2, kind: output, shape index: {}]  }
   0x1   :  { %8 = vsyncpa [#allocation6], 0 }
   0x2   :  { %9 = vsyncpa [#allocation4], 0  ;;  %s179_s9 = smov [#allocation2]   ;;  %s180_s11 = smov [#allocation5]  }
   0x3   :  { %s16_s10 = sshll.u32 %s179_s9, 4  ;;  %s26_s12 = sshll.u32 %s180_s11, 4  ;;  %s17_s10 = int_to_ptr.vmem [resolvable:$true] %s16_s10  ;;  %s27_s12 = int_to_ptr.vmem [resolvable:$true] %s26_s12 }
   0x4   :  { %s107_s15 = scalar_lea.hbm %s233_s0, 256 }
   0x5   :  { %p108_p0 = scmp.ne.s32.totalorder %s233_s0, %s107_s15  ;;  %p111_p1 = scmp.lt.u32.totalorder %s107_s15, %s233_s0 }
   0x7   :  { %p113_p2 = pnand %p111_p1, %p108_p0 }
   0x9   :  { %116 = shalt.err (!%p113_p2)
}
   0xa   :  { %s117_s20 = scalar_lea.vmem %s17_s10, 256  ;;  %p122_p4 = scmp.lt.s32.totalorder %s17_s10, %s17_s10 }
   0xb   :  { %p118_p3 = scmp.ne.s32.totalorder %s17_s10, %s117_s20  ;;  %p123_p5 = scmp.lt.s32.totalorder %s117_s20, %s117_s20 }
   0xd   :  { %p124_p6 = por %p123_p5, %p122_p4 }
   0xf   :  { %p125_p7 = pnand %p124_p6, %p118_p3 }
  0x11   :  { %128 = shalt.err (!%p125_p7)
}
  0x12   :  { %19 = dma.hbm_to_vmem [thread:$0]  %s233_s0, 256, %s17_s10, [#allocation3]  }
  0x13   :  { %s129_s25 = scalar_lea.hbm %s234_s1, 256 }
  0x14   :  { %p130_p8 = scmp.ne.s32.totalorder %s234_s1, %s129_s25  ;;  %p133_p9 = scmp.lt.u32.totalorder %s129_s25, %s234_s1 }
  0x16   :  { %p135_p10 = pnand %p133_p9, %p130_p8 }
  0x18   :  { %138 = shalt.err (!%p135_p10)
}
  0x19   :  { %s139_s30 = scalar_lea.vmem %s27_s12, 256  ;;  %p144_p12 = scmp.lt.s32.totalorder %s27_s12, %s27_s12 }
  0x1a   :  { %p140_p11 = scmp.ne.s32.totalorder %s27_s12, %s139_s30  ;;  %p145_p13 = scmp.lt.s32.totalorder %s139_s30, %s139_s30 }
  0x1c   :  { %p146_p0 = por %p145_p13, %p144_p12 }
  0x1e   :  { %p147_p1 = pnand %p146_p0, %p140_p11 }
  0x20   :  { %150 = shalt.err (!%p147_p1)
}
  0x21   :  { %29 = dma.hbm_to_vmem [thread:$0]  %s234_s1, 256, %s27_s12, [#allocation6]  }
  0x22   :  { %173 = dma.done.wait [#allocation3], 256  }
  0x23   :  { %174 = vsyncadd [#allocation3], 4294967040 }
  0x24   :  { %175 = dma.done.wait [#allocation6], 256  }
  0x25   :  { %176 = vsyncadd [#allocation6], 4294967040  ;;  %v38_v0 = vld [vmem:[#allocation5] sm:$0xff]  ;;  %v39_v1 = vld [vmem:[#allocation5 + $0x8] sm:$0xff]  ;;  %s181_s1 = smov [#allocation7]  }
  0x26   :  { %v36_v2 = vld [vmem:[#allocation2] sm:$0xff]  ;;  %v52_v3 = vadd.f32 %v39_v1, %v38_v0  ;;  %v37_v4 = vld [vmem:[#allocation2 + $0x8] sm:$0xff]  ;;  %v55_v6 = vmul.f32 %v38_v0, %v38_v0  ;;  %v56_v7 = vmul.f32 %v39_v1, %v39_v1  ;;  %s90_s4 = sshll.u32 %s181_s1, 4  ;;  %s91_s4 = int_to_ptr.vmem [resolvable:$true] %s90_s4 }
  0x27   :  { %v43_v5 = vmul.f32 %v36_v2, %v36_v2  ;;  %v44_v8 = vmul.f32 %v37_v4, %v37_v4  ;;  %v40_v9 = vadd.f32 %v37_v4, %v36_v2  ;;  %s151_s5 = scalar_lea.vmem %s91_s4, 256  ;;  %p156_p3 = scmp.lt.s32.totalorder %s91_s4, %s91_s4 }
  0x28   :  { %53 = vadd.xlane.f32.xlu0 %v52_v3  ;;  %v57_v11 = vadd.f32 %v56_v7, %v55_v6  ;;  %p152_p2 = scmp.ne.s32.totalorder %s91_s4, %s151_s5  ;;  %p157_p4 = scmp.lt.s32.totalorder %s151_s5, %s151_s5 }
  0x29   :  { %v45_v10 = vadd.f32 %v44_v8, %v43_v5 }
  0x2a   :  { %p158_p5 = por %p157_p4, %p156_p3 }
  0x2b   :  { %46 = vadd.xlane.f32.xlu1 %v45_v10 }
  0x2c   :  { %41 = vadd.xlane.f32.xlu0 %v40_v9  ;;  %p159_p6 = pnand %p158_p5, %p152_p2 }
  0x2f   :  { %58 = vadd.xlane.f32.xlu1 %v57_v11 }
  0xb5   :  { %v54_v12 = vpop.xlane.xlu0 %53 }
  0xb6   :  { %v60_v13 = vmul.f32 0.00390625, %v54_v12 }
  0xb8   :  { %v70_v14 = vadd.f32 1e-05, %v60_v13  ;;  %v47_v19 = vpop.xlane.xlu1 %46  ;;  %v61_v24 = vmul.f32 %v60_v13, %v54_v12 }
  0xb9   :  { %v42_v15 = vpop.xlane.xlu0 %41 }
  0xba   :  { %103 = vrsqrt.f32 %v70_v14  ;;  %v48_v16 = vmul.f32 0.00390625, %v42_v15  ;;  %vm73_vm0 = vcmp.eq.f32.partialorder %v70_v14, inf  ;;  %v76_v31 = vand.u32 2147483648, %v70_v14 }
  0xbb   :  { %vm75_vm1 = vcmp.eq.f32.partialorder %v70_v14, 0.0 }
  0xbc   :  { %v49_v17 = vmul.f32 %v48_v16, %v42_v15  ;;  %v66_v18 = vadd.f32 1e-05, %v48_v16  ;;  %v59_v23 = vpop.xlane.xlu1 %58 }
  0xbd   :  { %v62_v29 = vsub.f32 %v59_v23, %v61_v24 }
  0xbe   :  { %105 = vrsqrt.f32 %v66_v18  ;;  %v50_v20 = vsub.f32 %v47_v19, %v49_v17 }
  0xbf   :  { %v63_v35 = vmul.f32 0.003921569, %v62_v29 }
  0xc0   :  { %v51_v21 = vmul.f32 0.003921569, %v50_v20 }
  0xc2   :  { %v64_v26 = vsub.f32 %v36_v2, %v51_v21  ;;  %v65_v27 = vsub.f32 %v37_v4, %v51_v21 }
  0xc4   :  { %v104_v22 = vpop.eup %103 }
  0xc5   :  { %v72_v25 = vmul.f32 %v104_v22, %v70_v14 }
  0xc7   :  { %v74_v28 = vsel %vm73_vm0, %v70_v14, %v72_v25 }
  0xc8   :  { %v106_v30 = vpop.eup %105  ;;  %v77_v34 = vsel %vm75_vm1, %v76_v31, %v74_v28 }
  0xc9   :  { %v68_v32 = vmul.f32 %v106_v30, %v64_v26  ;;  %v69_v33 = vmul.f32 %v106_v30, %v65_v27 }
  0xcb   :  { %v78_v36 = vmul.f32 %v77_v34, %v68_v32  ;;  %v79_v37 = vmul.f32 %v77_v34, %v69_v33 }
  0xcd   :  { %v80_v38 = vadd.f32 %v78_v36, %v63_v35  ;;  %v81_v39 = vadd.f32 %v79_v37, %v63_v35 }
  0xcf   :  { %82 = vst [vmem:[#allocation7] sm:$0xff] %v80_v38  ;;  %83 = vst [vmem:[#allocation7 + $0x8] sm:$0xff] %v81_v39 }
  0xd0   :  { %162 = shalt.err (!%p159_p6)
}
  0xd1   :  { %s163_s8 = scalar_lea.hbm %s235_s2, 256 }
  0xd2   :  { %p164_p7 = scmp.ne.s32.totalorder %s235_s2, %s163_s8  ;;  %p167_p8 = scmp.lt.u32.totalorder %s163_s8, %s235_s2 }
  0xd4   :  { %p169_p9 = pnand %p167_p8, %p164_p7 }
  0xd6   :  { %172 = shalt.err (!%p169_p9)
}
  0xd7   :  { %93 = dma.vmem_to_hbm [thread:$0]  %s91_s4, 256, %s235_s2, [#allocation4]  }
  0xd8   :  { %177 = dma.done.wait [#allocation4], 256  }
  0xd9   :  { %178 = vsyncadd [#allocation4], 4294967040 }
  0xda   :  { %97 = vsyncpa [#allocation3], 1 }
  0xdb   :  { %98 = vsyncpa [#allocation6], 1 }
  0xdc   :  { %99 = vsyncpa [#allocation4], 1 }

</bundles_post_ra>
